<compile_context>
chip_gen: v7x
topology: tpu7x:2x2x1
jax: 0.10.0
libtpu: 0.0.40
codegen_flags: <defaults>
</compile_context>

<pallas_src>
import jax
import jax.numpy as jnp
from jax.experimental import pallas as pl
from jax.experimental.pallas import tpu as pltpu

_LANES = 128
_SUBLANES = 8
_TILE_ROWS_MAX = 2048   # rows of the packed (rows,128) slab per grid step (1 MiB f32)
_SCALING = 0.1          # huber default used by MSELoss.forward


def _cdiv(a, b):
    return -(-a // b)


def _round_up(x, m):
    return ((x + m - 1) // m) * m


def _pack_lane_dense(flat_f32, rows):
    """Zero-pad a flat f32 vector and reshape to a lane-dense (rows, 128) slab.

    Zero padding is exact for the huber term (x == y == 0 -> term == 0), so the
    padded elements contribute nothing to the accumulated sums."""
    pad = rows * _LANES - flat_f32.shape[0]
    return jnp.pad(flat_f32, (0, pad)).reshape(rows, _LANES)


def _fold_to_8x128(x, rows):
    """Sum a (rows, 128) value down to (8, 128) with a static, sublane-aligned
    tree of single-vreg adds (no XLU, no relayout: every slice is one full
    (8,128) tile)."""
    parts = [x[k * _SUBLANES:(k + 1) * _SUBLANES, :] for k in range(rows // _SUBLANES)]
    while len(parts) > 1:
        nxt = [a + b for a, b in zip(parts[0::2], parts[1::2])]
        if len(parts) % 2:
            nxt.append(parts[-1])
        parts = nxt
    return parts[0]


def _make_fused_loss_kernel(*, tile_rgb, tile_a, scaling, has_fine, has_alpha):
    inv_s2 = 1.0 / (float(scaling) * float(scaling))
    s = float(scaling)

    def huber_terms(x, y):
        d = x - y
        # 1 + d^2/s^2 >= 1 for finite inputs, so the reference's clamp(1e-4)
        # and abs() are no-ops and dropped.
        return (jnp.sqrt(1.0 + (d * d) * inv_s2) - 1.0) * s

    def kernel(*refs):
        it = iter(refs)
        xc_ref = next(it)
        xf_ref = next(it) if has_fine else None
        t_ref = next(it)
        pa_ref = next(it) if has_alpha else None
        ta_ref = next(it) if has_alpha else None
        out_rgb_ref = next(it)
        out_a_ref = next(it) if has_alpha else None

        i = pl.program_id(0)

        @pl.when(i == 0)
        def _init():
            out_rgb_ref[...] = jnp.zeros_like(out_rgb_ref)
            if has_alpha:
                out_a_ref[...] = jnp.zeros_like(out_a_ref)

        t = t_ref[...]
        terms = huber_terms(xc_ref[...], t)
        if has_fine:
            terms = terms + huber_terms(xf_ref[...], t)
        out_rgb_ref[...] += _fold_to_8x128(terms, tile_rgb)

        if has_alpha:
            a_terms = huber_terms(pa_ref[...], ta_ref[...])
            out_a_ref[...] += _fold_to_8x128(a_terms, tile_a)

    return kernel


def mse_loss_forward(inputs, targets, w_alpha=0.0, scaling=_SCALING,
                     tile_rows_max=_TILE_ROWS_MAX):
    """Matches MSELoss.forward from the PyTorch module (including its reuse of
    the *coarse* weight sum in the weights_fine branch)."""
    rgb_c = jnp.asarray(inputs["rgb_coarse"])
    targets = jnp.asarray(targets)
    n = int(rgb_c.shape[0])
    n_tgt_cols = int(targets.shape[1])
    has_fine = "rgb_fine" in inputs
    has_alpha = (float(w_alpha) > 0.0) and (n_tgt_cols > 3)

    # ---- lane-dense repacking (one-time layout plumbing in the wrapper) ----
    xc_flat = rgb_c.astype(jnp.float32).reshape(-1)                 # (3N,)
    t_rgb_flat = targets[:, :3].astype(jnp.float32).reshape(-1)     # (3N,)

    rows_rgb0 = _cdiv(3 * n, _LANES)
    tile_rgb = min(int(tile_rows_max), _round_up(rows_rgb0, _SUBLANES))
    num_blocks = _cdiv(rows_rgb0, tile_rgb)
    rows_rgb = num_blocks * tile_rgb

    rgb_spec = pl.BlockSpec((tile_rgb, _LANES), lambda i: (i, 0))

    operands = [_pack_lane_dense(xc_flat, rows_rgb)]
    in_specs = [rgb_spec]
    if has_fine:
        xf_flat = jnp.asarray(inputs["rgb_fine"]).astype(jnp.float32).reshape(-1)
        operands.append(_pack_lane_dense(xf_flat, rows_rgb))
        in_specs.append(rgb_spec)
    operands.append(_pack_lane_dense(t_rgb_flat, rows_rgb))
    in_specs.append(rgb_spec)

    tile_a = _SUBLANES
    if has_alpha:
        # Per-ray opacity: a plain dense row-sum over the (N, S) weights; XLA
        # streams the weights once at roofline, and the tiny (N,) result is fed
        # lane-dense into the fused kernel.
        w = jnp.asarray(inputs["weights_coarse"]).astype(jnp.float32)
        pix_alpha = jnp.sum(w, axis=1)                               # (N,)
        t_alpha = targets[:, 3].astype(jnp.float32)                  # (N,)
        rows_a0 = _cdiv(n, _LANES)
        tile_a = _round_up(_cdiv(rows_a0, num_blocks), _SUBLANES)
        rows_a = num_blocks * tile_a
        a_spec = pl.BlockSpec((tile_a, _LANES), lambda i: (i, 0))
        operands.append(_pack_lane_dense(pix_alpha, rows_a))
        operands.append(_pack_lane_dense(t_alpha, rows_a))
        in_specs.extend([a_spec, a_spec])

    out_block = pl.BlockSpec((_SUBLANES, _LANES), lambda i: (0, 0))
    if has_alpha:
        out_shape = (jax.ShapeDtypeStruct((_SUBLANES, _LANES), jnp.float32),
                     jax.ShapeDtypeStruct((_SUBLANES, _LANES), jnp.float32))
        out_specs = (out_block, out_block)
    else:
        out_shape = jax.ShapeDtypeStruct((_SUBLANES, _LANES), jnp.float32)
        out_specs = out_block

    kernel = _make_fused_loss_kernel(
        tile_rgb=tile_rgb, tile_a=tile_a, scaling=scaling,
        has_fine=has_fine, has_alpha=has_alpha)

    out = pl.pallas_call(
        kernel,
        out_shape=out_shape,
        grid=(num_blocks,),
        in_specs=in_specs,
        out_specs=out_specs,
        compiler_params=pltpu.CompilerParams(
            dimension_semantics=("arbitrary",),
            vmem_limit_bytes=32 * 1024 * 1024),
    )(*operands)

    if has_alpha:
        out_rgb, out_a = out
    else:
        out_rgb = out

    loss = jnp.sum(out_rgb) / jnp.float32(3 * n)     # mean_coarse (+ mean_fine)
    if has_alpha:
        # The reference module recomputes pix_alpha from the *coarse* weights in
        # its 'weights_fine' branch, so the same alpha term is counted twice.
        mult = 2.0 if "weights_fine" in inputs else 1.0
        loss = loss + (jnp.sum(out_a) / jnp.float32(n)) * jnp.float32(float(w_alpha) * mult)
    return loss


if __name__ == "__main__":
    key = jax.random.PRNGKey(0)
    k1, k2, k3, k4, k5 = jax.random.split(key, 5)

    # pure-JAX reference
    def huber_ref(x, y, scaling=0.1):
        diff_sq = (x - y) ** 2
        t = (jnp.sqrt(jnp.clip(1.0 + diff_sq / scaling ** 2, 0.0001)) - 1.0) * scaling
        return jnp.mean(jnp.abs(t))

    # --- test 1: coarse + fine + alpha, N not a multiple of anything nice ---
    N, S = 100, 64
    inputs = {
        "rgb_coarse": jax.random.uniform(k1, (N, 3), jnp.float32),
        "rgb_fine": jax.random.uniform(k2, (N, 3), jnp.float32),
        "weights_coarse": jax.random.uniform(k3, (N, S), jnp.float32) / S,
        "weights_fine": jax.random.uniform(k4, (N, S), jnp.float32) / S,
    }
    targets = jax.random.uniform(k5, (N, 4), jnp.float32)

    loss = mse_loss_forward(inputs, targets, w_alpha=0.5)
    jax.block_until_ready(loss)

    ref = huber_ref(inputs["rgb_coarse"], targets[:, :3])
    ref = ref + huber_ref(inputs["rgb_fine"], targets[:, :3])
    pa = inputs["weights_coarse"].sum(axis=1)
    ref = ref + huber_ref(pa, targets[:, 3]) * 0.5
    ref = ref + huber_ref(pa, targets[:, 3]) * 0.5
    assert jnp.allclose(loss, ref, rtol=1e-5, atol=1e-6), (loss, ref)

    # --- test 2: coarse-only / no-alpha path ---
    loss2 = mse_loss_forward({"rgb_coarse": inputs["rgb_coarse"]},
                             targets[:, :3], w_alpha=0.0)
    jax.block_until_ready(loss2)
    ref2 = huber_ref(inputs["rgb_coarse"], targets[:, :3])
    assert jnp.allclose(loss2, ref2, rtol=1e-5, atol=1e-6), (loss2, ref2)

    # --- test 3: force multiple grid blocks (small tiles) to exercise the
    #     accumulator / multi-step path ---
    k6, k7, k8, k9 = jax.random.split(jax.random.PRNGKey(1), 4)
    N3, S3 = 512, 32
    inputs3 = {
        "rgb_coarse": jax.random.uniform(k6, (N3, 3), jnp.float32),
        "rgb_fine": jax.random.uniform(k7, (N3, 3), jnp.float32),
        "weights_coarse": jax.random.uniform(k8, (N3, S3), jnp.float32) / S3,
    }
    targets3 = jax.random.uniform(k9, (N3, 4), jnp.float32)
    loss3 = mse_loss_forward(inputs3, targets3, w_alpha=0.25, tile_rows_max=8)
    jax.block_until_ready(loss3)
    ref3 = huber_ref(inputs3["rgb_coarse"], targets3[:, :3])
    ref3 = ref3 + huber_ref(inputs3["rgb_fine"], targets3[:, :3])
    pa3 = inputs3["weights_coarse"].sum(axis=1)
    ref3 = ref3 + huber_ref(pa3, targets3[:, 3]) * 0.25
    assert jnp.allclose(loss3, ref3, rtol=1e-5, atol=1e-6), (loss3, ref3)

    print("KERNEL_OK")
</pallas_src>

<mosaic_0001>
module attributes {stable_mosaic.version = 11 : i64} {
  func.func @kernel(%arg0: i32, %arg1: memref<8x128xf32, #tpu.memory_space<vmem>>, %arg2: memref<8x128xf32, #tpu.memory_space<vmem>>, %arg3: memref<8x128xf32, #tpu.memory_space<vmem>>, %arg4: memref<8x128xf32, #tpu.memory_space<vmem>>, %arg5: memref<8x128xf32, #tpu.memory_space<vmem>>, %arg6: memref<8x128xf32, #tpu.memory_space<vmem>>, %arg7: memref<8x128xf32, #tpu.memory_space<vmem>>) attributes {dimension_semantics = [#tpu.dimension_semantics<arbitrary>], iteration_bounds = array<i64: 1>, scalar_prefetch = 0 : i64, scratch_operands = 0 : i64, tpu.core_type = #tpu.core_type<tc>, window_params = [{transform_indices = @transform_0, window_bounds = array<i64: 8, 128>}, {transform_indices = @transform_1, window_bounds = array<i64: 8, 128>}, {transform_indices = @transform_2, window_bounds = array<i64: 8, 128>}, {transform_indices = @transform_3, window_bounds = array<i64: 8, 128>}, {transform_indices = @transform_4, window_bounds = array<i64: 8, 128>}, {pipeline_mode = #tpu.pipeline_mode<synchronous>, transform_indices = @transform_5, window_bounds = array<i64: 8, 128>}, {pipeline_mode = #tpu.pipeline_mode<synchronous>, transform_indices = @transform_6, window_bounds = array<i64: 8, 128>}]} {
    %c0_i32 = arith.constant 0 : i32
    %0 = arith.cmpi eq, %arg0, %c0_i32 : i32
    %1 = arith.extui %0 : i1 to i32
    %c0_i32_0 = arith.constant 0 : i32
    %2 = arith.cmpi ne, %1, %c0_i32_0 : i32
    scf.if %2 {
      %cst_29 = arith.constant 0.000000e+00 : f32
      %48 = vector.broadcast %cst_29 : f32 to vector<8x128xf32>
      %c0_30 = arith.constant 0 : index
      %c0_31 = arith.constant 0 : index
      %49 = vector.load %arg6[%c0_30, %c0_31] : memref<8x128xf32, #tpu.memory_space<vmem>>, vector<8x128xf32>
      tpu.vector_store %arg6[%c0_30, %c0_31], %48 {strides = array<i32>} : memref<8x128xf32, #tpu.memory_space<vmem>>, vector<8x128xf32>,
      %cst_32 = arith.constant 0.000000e+00 : f32
      %50 = vector.broadcast %cst_32 : f32 to vector<8x128xf32>
      %c0_33 = arith.constant 0 : index
      %c0_34 = arith.constant 0 : index
      %51 = vector.load %arg7[%c0_33, %c0_34] : memref<8x128xf32, #tpu.memory_space<vmem>>, vector<8x128xf32>
      tpu.vector_store %arg7[%c0_33, %c0_34], %50 {strides = array<i32>} : memref<8x128xf32, #tpu.memory_space<vmem>>, vector<8x128xf32>,
    } else {
    }
    %c0 = arith.constant 0 : index
    %c0_1 = arith.constant 0 : index
    %3 = vector.load %arg3[%c0, %c0_1] : memref<8x128xf32, #tpu.memory_space<vmem>>, vector<8x128xf32>
    %c0_2 = arith.constant 0 : index
    %c0_3 = arith.constant 0 : index
    %4 = vector.load %arg1[%c0_2, %c0_3] : memref<8x128xf32, #tpu.memory_space<vmem>>, vector<8x128xf32>
    %5 = arith.subf %4, %3 : vector<8x128xf32>
    %6 = arith.mulf %5, %5 : vector<8x128xf32>
    %cst = arith.constant 1.000000e+02 : f32
    %7 = vector.broadcast %cst : f32 to vector<8x128xf32>
    %8 = arith.mulf %6, %7 : vector<8x128xf32>
    %cst_4 = arith.constant 1.000000e+00 : f32
    %9 = vector.broadcast %cst_4 : f32 to vector<8x128xf32>
    %10 = arith.addf %9, %8 : vector<8x128xf32>
    %11 = math.sqrt %10 : vector<8x128xf32>
    %cst_5 = arith.constant 1.000000e+00 : f32
    %12 = vector.broadcast %cst_5 : f32 to vector<8x128xf32>
    %13 = arith.subf %11, %12 : vector<8x128xf32>
    %cst_6 = arith.constant 1.000000e-01 : f32
    %14 = vector.broadcast %cst_6 : f32 to vector<8x128xf32>
    %15 = arith.mulf %13, %14 : vector<8x128xf32>
    %c0_7 = arith.constant 0 : index
    %c0_8 = arith.constant 0 : index
    %16 = vector.load %arg2[%c0_7, %c0_8] : memref<8x128xf32, #tpu.memory_space<vmem>>, vector<8x128xf32>
    %17 = arith.subf %16, %3 : vector<8x128xf32>
    %18 = arith.mulf %17, %17 : vector<8x128xf32>
    %cst_9 = arith.constant 1.000000e+02 : f32
    %19 = vector.broadcast %cst_9 : f32 to vector<8x128xf32>
    %20 = arith.mulf %18, %19 : vector<8x128xf32>
    %cst_10 = arith.constant 1.000000e+00 : f32
    %21 = vector.broadcast %cst_10 : f32 to vector<8x128xf32>
    %22 = arith.addf %21, %20 : vector<8x128xf32>
    %23 = math.sqrt %22 : vector<8x128xf32>
    %cst_11 = arith.constant 1.000000e+00 : f32
    %24 = vector.broadcast %cst_11 : f32 to vector<8x128xf32>
    %25 = arith.subf %23, %24 : vector<8x128xf32>
    %cst_12 = arith.constant 1.000000e-01 : f32
    %26 = vector.broadcast %cst_12 : f32 to vector<8x128xf32>
    %27 = arith.mulf %25, %26 : vector<8x128xf32>
    %28 = arith.addf %15, %27 : vector<8x128xf32>
    %c0_13 = arith.constant 0 : index
    %c0_14 = arith.constant 0 : index
    %29 = vector.load %arg6[%c0_13, %c0_14] : memref<8x128xf32, #tpu.memory_space<vmem>>, vector<8x128xf32>
    %30 = arith.addf %29, %28 : vector<8x128xf32>
    %c0_15 = arith.constant 0 : index
    %c0_16 = arith.constant 0 : index
    %31 = vector.load %arg6[%c0_15, %c0_16] : memref<8x128xf32, #tpu.memory_space<vmem>>, vector<8x128xf32>
    tpu.vector_store %arg6[%c0_15, %c0_16], %30 {strides = array<i32>} : memref<8x128xf32, #tpu.memory_space<vmem>>, vector<8x128xf32>,
    %c0_17 = arith.constant 0 : index
    %c0_18 = arith.constant 0 : index
    %32 = vector.load %arg4[%c0_17, %c0_18] : memref<8x128xf32, #tpu.memory_space<vmem>>, vector<8x128xf32>
    %c0_19 = arith.constant 0 : index
    %c0_20 = arith.constant 0 : index
    %33 = vector.load %arg5[%c0_19, %c0_20] : memref<8x128xf32, #tpu.memory_space<vmem>>, vector<8x128xf32>
    %34 = arith.subf %32, %33 : vector<8x128xf32>
    %35 = arith.mulf %34, %34 : vector<8x128xf32>
    %cst_21 = arith.constant 1.000000e+02 : f32
    %36 = vector.broadcast %cst_21 : f32 to vector<8x128xf32>
    %37 = arith.mulf %35, %36 : vector<8x128xf32>
    %cst_22 = arith.constant 1.000000e+00 : f32
    %38 = vector.broadcast %cst_22 : f32 to vector<8x128xf32>
    %39 = arith.addf %38, %37 : vector<8x128xf32>
    %40 = math.sqrt %39 : vector<8x128xf32>
    %cst_23 = arith.constant 1.000000e+00 : f32
    %41 = vector.broadcast %cst_23 : f32 to vector<8x128xf32>
    %42 = arith.subf %40, %41 : vector<8x128xf32>
    %cst_24 = arith.constant 1.000000e-01 : f32
    %43 = vector.broadcast %cst_24 : f32 to vector<8x128xf32>
    %44 = arith.mulf %42, %43 : vector<8x128xf32>
    %c0_25 = arith.constant 0 : index
    %c0_26 = arith.constant 0 : index
    %45 = vector.load %arg7[%c0_25, %c0_26] : memref<8x128xf32, #tpu.memory_space<vmem>>, vector<8x128xf32>
    %46 = arith.addf %45, %44 : vector<8x128xf32>
    %c0_27 = arith.constant 0 : index
    %c0_28 = arith.constant 0 : index
    %47 = vector.load %arg7[%c0_27, %c0_28] : memref<8x128xf32, #tpu.memory_space<vmem>>, vector<8x128xf32>
    tpu.vector_store %arg7[%c0_27, %c0_28], %46 {strides = array<i32>} : memref<8x128xf32, #tpu.memory_space<vmem>>, vector<8x128xf32>,
    return
  }
  func.func @transform_0(%arg0: i32) -> (i32, i32) {
    %c0_i32 = arith.constant 0 : i32
    %c0_i32_0 = arith.constant 0 : i32
    return %arg0, %c0_i32 : i32, i32
  }
  func.func @transform_1(%arg0: i32) -> (i32, i32) {
    %c0_i32 = arith.constant 0 : i32
    %c0_i32_0 = arith.constant 0 : i32
    return %arg0, %c0_i32 : i32, i32
  }
  func.func @transform_2(%arg0: i32) -> (i32, i32) {
    %c0_i32 = arith.constant 0 : i32
    %c0_i32_0 = arith.constant 0 : i32
    return %arg0, %c0_i32 : i32, i32
  }
  func.func @transform_3(%arg0: i32) -> (i32, i32) {
    %c0_i32 = arith.constant 0 : i32
    %c0_i32_0 = arith.constant 0 : i32
    return %arg0, %c0_i32 : i32, i32
  }
  func.func @transform_4(%arg0: i32) -> (i32, i32) {
    %c0_i32 = arith.constant 0 : i32
    %c0_i32_0 = arith.constant 0 : i32
    return %arg0, %c0_i32 : i32, i32
  }
  func.func @transform_5(%arg0: i32) -> (i32, i32) {
    %c0_i32 = arith.constant 0 : i32
    %c0_i32_0 = arith.constant 0 : i32
    %c0_i32_1 = arith.constant 0 : i32
    return %c0_i32, %c0_i32_0 : i32, i32
  }
  func.func @transform_6(%arg0: i32) -> (i32, i32) {
    %c0_i32 = arith.constant 0 : i32
    %c0_i32_0 = arith.constant 0 : i32
    %c0_i32_1 = arith.constant 0 : i32
    return %c0_i32, %c0_i32_0 : i32, i32
  }
}

</mosaic_0001>

<bundles_post_ra>
// kernel: tpu_custom_call.1
= control target key start
LH: loop header
LB: loop body
LE: loop exit
PB: predicated region body
PF: predicated region fallthrough
CT: control target
= control target key end

     0   :  { %12 = vsyncpa [#allocation3], 0  ;;  %s433_s0 = inlined_call_operand.hbm [shape: f32[8,128], index: 0, kind: input, shape index: {}]   ;;  %s434_s1 = inlined_call_operand.hbm [shape: f32[8,128], index: 1, kind: input, shape index: {}]   ;;  %s435_s2 = inlined_call_operand.hbm [shape: f32[8,128], index: 2, kind: input, shape index: {}]   ;;  %s436_s3 = inlined_call_operand.vmem [shape: f32[8,128], index: 3, kind: input, shape index: {}]   ;;  %s437_s4 = inlined_call_operand.hbm [shape: f32[8,128], index: 4, kind: input, shape index: {}]   ;;  %s438_s5 = inlined_call_operand.hbm [shape: f32[8,128], index: 5, kind: output, shape index: {0}]   ;;  %s439_s6 = inlined_call_operand.hbm [shape: f32[8,128], index: 6, kind: output, shape index: {1}]  }
   0x1   :  { %13 = vsyncpa [#allocation6], 0 }
   0x2   :  { %14 = vsyncpa [#allocation9], 0 }
   0x3   :  { %15 = vsyncpa [#allocation4], 0 }
   0x4   :  { %16 = vsyncpa [#allocation12], 0  ;;  %s317_s21 = smov [#allocation5]   ;;  %s318_s23 = smov [#allocation2]  }
   0x5   :  { %s33_s22 = sshll.u32 %s317_s21, 4  ;;  %s23_s24 = sshll.u32 %s318_s23, 4  ;;  %s34_s22 = int_to_ptr.vmem [resolvable:$true] %s33_s22  ;;  %s24_s24 = int_to_ptr.vmem [resolvable:$true] %s23_s24 }
   0x6   :  { %s175_s27 = scalar_lea.hbm %s434_s1, 128 }
   0x7   :  { %p176_p0 = scmp.ne.s32.totalorder %s434_s1, %s175_s27  ;;  %p179_p1 = scmp.lt.u32.totalorder %s175_s27, %s434_s1 }
   0x9   :  { %p181_p2 = pnand %p179_p1, %p176_p0 }
   0xb   :  { %184 = shalt.err (!%p181_p2)
}
   0xc   :  { %s185_s8 = scalar_lea.vmem %s34_s22, 128  ;;  %p190_p4 = scmp.lt.s32.totalorder %s34_s22, %s34_s22 }
   0xd   :  { %p186_p3 = scmp.ne.s32.totalorder %s34_s22, %s185_s8  ;;  %p191_p5 = scmp.lt.s32.totalorder %s185_s8, %s185_s8 }
   0xf   :  { %p192_p6 = por %p191_p5, %p190_p4 }
  0x11   :  { %p193_p7 = pnand %p192_p6, %p186_p3 }
  0x13   :  { %196 = shalt.err (!%p193_p7)
}
  0x14   :  { %36 = dma.hbm_to_vmem [thread:$0]  %s434_s1, 128, %s34_s22, [#allocation6]  }
  0x15   :  { %s197_s13 = scalar_lea.hbm %s433_s0, 128 }
  0x16   :  { %p198_p8 = scmp.ne.s32.totalorder %s433_s0, %s197_s13  ;;  %p201_p9 = scmp.lt.u32.totalorder %s197_s13, %s433_s0 }
  0x18   :  { %p203_p10 = pnand %p201_p9, %p198_p8 }
  0x1a   :  { %206 = shalt.err (!%p203_p10)
}
  0x1b   :  { %s207_s18 = scalar_lea.vmem %s24_s24, 128  ;;  %p212_p12 = scmp.lt.s32.totalorder %s24_s24, %s24_s24 }
  0x1c   :  { %p208_p11 = scmp.ne.s32.totalorder %s24_s24, %s207_s18  ;;  %p213_p13 = scmp.lt.s32.totalorder %s207_s18, %s207_s18 }
  0x1e   :  { %p214_p0 = por %p213_p13, %p212_p12 }
  0x20   :  { %p215_p1 = pnand %p214_p0, %p208_p11 }
  0x22   :  { %218 = shalt.err (!%p215_p1)
}
  0x23   :  { %26 = dma.hbm_to_vmem [thread:$0]  %s433_s0, 128, %s24_s24, [#allocation3]  }
  0x24   :  { %s319_s20 = smov [#allocation7]   ;;  %s320_s22 = smov [#allocation8]  }
  0x25   :  { %s43_s21 = sshll.u32 %s319_s20, 4  ;;  %s55_s23 = sshll.u32 %s320_s22, 4  ;;  %s44_s21 = int_to_ptr.vmem [resolvable:$true] %s43_s21  ;;  %s56_s23 = int_to_ptr.vmem [resolvable:$true] %s55_s23 }
  0x26   :  { %s219_s27 = scalar_lea.hbm %s435_s2, 128 }
  0x27   :  { %p220_p2 = scmp.ne.s32.totalorder %s435_s2, %s219_s27  ;;  %p223_p3 = scmp.lt.u32.totalorder %s219_s27, %s435_s2 }
  0x29   :  { %p225_p4 = pnand %p223_p3, %p220_p2 }
  0x2b   :  { %228 = shalt.err (!%p225_p4)
}
  0x2c   :  { %s229_s0 = scalar_lea.vmem %s44_s21, 128  ;;  %p234_p6 = scmp.lt.s32.totalorder %s44_s21, %s44_s21 }
  0x2d   :  { %p230_p5 = scmp.ne.s32.totalorder %s44_s21, %s229_s0  ;;  %p235_p7 = scmp.lt.s32.totalorder %s229_s0, %s229_s0 }
  0x2f   :  { %p236_p8 = por %p235_p7, %p234_p6 }
  0x31   :  { %p237_p9 = pnand %p236_p8, %p230_p5 }
  0x33   :  { %240 = shalt.err (!%p237_p9)
}
  0x34   :  { %46 = dma.hbm_to_vmem [thread:$0]  %s435_s2, 128, %s44_s21, [#allocation6]  }
  0x35   :  { %s241_s11 = scalar_lea.hbm %s437_s4, 128 }
  0x36   :  { %p242_p10 = scmp.ne.s32.totalorder %s437_s4, %s241_s11  ;;  %p245_p11 = scmp.lt.u32.totalorder %s241_s11, %s437_s4 }
  0x38   :  { %p247_p12 = pnand %p245_p11, %p242_p10 }
  0x3a   :  { %250 = shalt.err (!%p247_p12)
}
  0x3b   :  { %s251_s16 = scalar_lea.vmem %s56_s23, 128  ;;  %p256_p0 = scmp.lt.s32.totalorder %s56_s23, %s56_s23 }
  0x3c   :  { %p252_p13 = scmp.ne.s32.totalorder %s56_s23, %s251_s16  ;;  %p257_p1 = scmp.lt.s32.totalorder %s251_s16, %s251_s16 }
  0x3e   :  { %p258_p2 = por %p257_p1, %p256_p0 }
  0x40   :  { %p259_p3 = pnand %p258_p2, %p252_p13 }
  0x42   :  { %262 = shalt.err (!%p259_p3)
}
  0x43   :  { %58 = dma.hbm_to_vmem [thread:$0]  %s437_s4, 128, %s56_s23, [#allocation9]  }
  0x44   :  { %307 = dma.done.wait [#allocation3], 128  }
  0x45   :  { %308 = vsyncadd [#allocation3], 4294967168 }
  0x46   :  { %309 = dma.done.wait [#allocation6], 256  }
  0x47   :  { %310 = vsyncadd [#allocation6], 4294967040 }
  0x48   :  { %311 = dma.done.wait [#allocation9], 128  }
  0x49   :  { %312 = vsyncadd [#allocation9], 4294967168  ;;  %v77_v0 = vld [vmem:[#allocation7] sm:$0xff]  ;;  %v78_v1 = vld [vmem:[#allocation2] sm:$0xff]  ;;  %s322_s19 = smov [#allocation10]  }
  0x4a   :  { %v92_v2 = vld [vmem:[#allocation5] sm:$0xff]  ;;  %v79_v3 = vsub.f32 %v78_v1, %v77_v0  ;;  %v110_v5 = vld [vmem:[%s436_s3] sm:$0xff]  ;;  %v111_v6 = vld [vmem:[#allocation8] sm:$0xff]  ;;  %s321_s3 = smov [#allocation11]   ;;  %s134_s20 = sshll.u32 %s322_s19, 4  ;;  %s135_s20 = int_to_ptr.vmem [resolvable:$true] %s134_s20 }
  0x4b   :  { %v93_v4 = vsub.f32 %v92_v2, %v77_v0  ;;  %v112_v7 = vsub.f32 %v110_v5, %v111_v6  ;;  %s144_s4 = sshll.u32 %s321_s3, 4  ;;  %s145_s4 = int_to_ptr.vmem [resolvable:$true] %s144_s4 }
  0x4c   :  { %v80_v8 = vmul.f32 %v79_v3, %v79_v3  ;;  %s263_s21 = scalar_lea.vmem %s145_s4, 128  ;;  %p268_p5 = scmp.lt.s32.totalorder %s145_s4, %s145_s4 }
  0x4d   :  { %v94_v9 = vmul.f32 %v93_v4, %v93_v4  ;;  %v113_v10 = vmul.f32 %v112_v7, %v112_v7  ;;  %p264_p4 = scmp.ne.s32.totalorder %s145_s4, %s263_s21  ;;  %p269_p6 = scmp.lt.s32.totalorder %s263_s21, %s263_s21 }
  0x4e   :  { %v81_v11 = vmul.f32 100.0, %v80_v8 }
  0x4f   :  { %v95_v12 = vmul.f32 100.0, %v94_v9  ;;  %v114_v13 = vmul.f32 100.0, %v113_v10  ;;  %p270_p7 = por %p269_p6, %p268_p5 }
  0x50   :  { %v82_v14 = vadd.f32 1.0, %v81_v11 }
  0x51   :  { %v96_v15 = vadd.f32 1.0, %v95_v12  ;;  %v115_v16 = vadd.f32 1.0, %v114_v13  ;;  %p271_p8 = pnand %p270_p7, %p264_p4 }
  0x52   :  { %169 = vrsqrt.f32 %v82_v14  ;;  %vm85_vm0 = vcmp.eq.f32.partialorder %v82_v14, inf  ;;  %v88_v18 = vand.u32 2147483648, %v82_v14  ;;  %vm87_vm1 = vcmp.eq.f32.partialorder %v82_v14, 0.0 }
  0x53   :  { %171 = vrsqrt.f32 %v96_v15  ;;  %vm99_vm2 = vcmp.eq.f32.partialorder %v96_v15, inf  ;;  %v102_v21 = vand.u32 2147483648, %v96_v15  ;;  %vm101_vm3 = vcmp.eq.f32.partialorder %v96_v15, 0.0 }
  0x54   :  { %173 = vrsqrt.f32 %v115_v16  ;;  %vm118_vm4 = vcmp.eq.f32.partialorder %v115_v16, inf  ;;  %v121_v24 = vand.u32 2147483648, %v115_v16  ;;  %vm120_vm5 = vcmp.eq.f32.partialorder %v115_v16, 0.0 }
  0x5c   :  { %v170_v17 = vpop.eup %169 }
  0x5d   :  { %v172_v19 = vpop.eup %171  ;;  %v84_v20 = vmul.f32 %v170_v17, %v82_v14 }
  0x5e   :  { %v174_v22 = vpop.eup %173  ;;  %v98_v23 = vmul.f32 %v172_v19, %v96_v15 }
  0x5f   :  { %v86_v25 = vsel %vm85_vm0, %v82_v14, %v84_v20  ;;  %v117_v26 = vmul.f32 %v174_v22, %v115_v16 }
  0x60   :  { %v89_v27 = vsel %vm87_vm1, %v88_v18, %v86_v25  ;;  %v100_v28 = vsel %vm99_vm2, %v96_v15, %v98_v23 }
  0x61   :  { %v159_v29 = vadd.f32 -1.0, %v89_v27  ;;  %v103_v30 = vsel %vm101_vm3, %v102_v21, %v100_v28  ;;  %v119_v31 = vsel %vm118_vm4, %v115_v16, %v117_v26 }
  0x62   :  { %v160_v32 = vadd.f32 -1.0, %v103_v30  ;;  %v122_v33 = vsel %vm120_vm5, %v121_v24, %v119_v31 }
  0x63   :  { %v91_v34 = vmul.f32 0.1, %v159_v29  ;;  %v161_v35 = vadd.f32 -1.0, %v122_v33 }
  0x64   :  { %v105_v36 = vmul.f32 0.1, %v160_v32 }
  0x65   :  { %v124_v37 = vmul.f32 0.1, %v161_v35 }
  0x66   :  { %v106_v38 = vadd.f32 %v105_v36, %v91_v34 }
  0x67   :  { %127 = vst [vmem:[#allocation11] sm:$0xff] %v124_v37 }
  0x68   :  { %109 = vst [vmem:[#allocation10] sm:$0xff] %v106_v38 }
  0x69   :  { %274 = shalt.err (!%p271_p8)
}
  0x6a   :  { %s275_s25 = scalar_lea.hbm %s439_s6, 128 }
  0x6b   :  { %p276_p9 = scmp.ne.s32.totalorder %s439_s6, %s275_s25  ;;  %p279_p10 = scmp.lt.u32.totalorder %s275_s25, %s439_s6 }
  0x6d   :  { %p281_p11 = pnand %p279_p10, %p276_p9 }
  0x6f   :  { %284 = shalt.err (!%p281_p11)
}
  0x70   :  { %147 = dma.vmem_to_hbm [thread:$0]  %s145_s4, 128, %s439_s6, [#allocation12]  }
  0x71   :  { %s285_s0 = scalar_lea.vmem %s135_s20, 128  ;;  %p290_p13 = scmp.lt.s32.totalorder %s135_s20, %s135_s20 }
  0x72   :  { %p286_p12 = scmp.ne.s32.totalorder %s135_s20, %s285_s0  ;;  %p291_p0 = scmp.lt.s32.totalorder %s285_s0, %s285_s0 }
  0x74   :  { %p292_p1 = por %p291_p0, %p290_p13 }
  0x76   :  { %p293_p2 = pnand %p292_p1, %p286_p12 }
  0x78   :  { %296 = shalt.err (!%p293_p2)
}
  0x79   :  { %s297_s9 = scalar_lea.hbm %s438_s5, 128 }
  0x7a   :  { %p298_p3 = scmp.ne.s32.totalorder %s438_s5, %s297_s9  ;;  %p301_p4 = scmp.lt.u32.totalorder %s297_s9, %s438_s5 }
  0x7c   :  { %p303_p5 = pnand %p301_p4, %p298_p3 }
  0x7e   :  { %306 = shalt.err (!%p303_p5)
}
  0x7f   :  { %137 = dma.vmem_to_hbm [thread:$0]  %s135_s20, 128, %s438_s5, [#allocation4]  }
  0x80   :  { %313 = dma.done.wait [#allocation4], 128  }
  0x81   :  { %314 = vsyncadd [#allocation4], 4294967168 }
  0x82   :  { %315 = dma.done.wait [#allocation12], 128  }
  0x83   :  { %316 = vsyncadd [#allocation12], 4294967168 }
  0x84   :  { %154 = vsyncpa [#allocation3], 1 }
  0x85   :  { %155 = vsyncpa [#allocation6], 1 }
  0x86   :  { %156 = vsyncpa [#allocation9], 1 }
  0x87   :  { %157 = vsyncpa [#allocation4], 1 }
  0x88   :  { %158 = vsyncpa [#allocation12], 1 }

</bundles_post_ra>
